<compile_context>
chip_gen: v5e
topology: v5e:2x2
jax: 0.10.0
libtpu: 0.0.40
codegen_flags: <defaults>
</compile_context>

<pallas_src>
import jax
import jax.numpy as jnp
from jax import lax
from jax.experimental import pallas as pl
from jax.experimental.pallas import tpu as pltpu


def _round_up(n, m):
    return ((n + m - 1) // m) * m


# Contract the last dim of both operands: result[m, n] = sum_k A[m, k] * B[n, k]
_NT_DIMS = (((1,), (1,)), ((), ()))


def _mlp_kernel(x_ref, w1_ref, b1_ref, w2_ref, b2_ref, w3_ref, b3_ref, o_ref):
    # x_ref : (TB, 10)  f32   -- raw batch rows (no wrapper pad/cast/transpose)
    # w1_ref: (256, 10) bf16    b1_ref: (256, 1) f32
    # w2_ref: (128,256) bf16    b2_ref: (128, 1) f32
    # w3_ref: (128, 1)  f32     b3_ref: (1, 1)   f32 (SMEM scalar)
    # o_ref : (1, TB)   f32   -- lane-dense output slab

    # fc1: h1^T = w1 @ x^T via an NT dot_general (bf16 MXU, f32 accumulation).
    xb = x_ref[...].astype(jnp.bfloat16)                       # (TB, 10)
    h1 = lax.dot_general(w1_ref[...], xb, _NT_DIMS,
                         preferred_element_type=jnp.float32)   # (256, TB)
    # Bias + ReLU in f32; cast to bf16 fused into the same elementwise pass so
    # only the bf16 h1 buffer persists (smaller VMEM, feeds fc2 directly).
    h1 = jnp.maximum(h1 + b1_ref[...], 0.0).astype(jnp.bfloat16)
    # dropout (eval mode) -> identity

    # fc2 + bias + ReLU (bf16 MXU matmul, f32 accumulation/elementwise)
    h2 = jnp.dot(w2_ref[...], h1, preferred_element_type=jnp.float32)  # (128, TB)
    h2 = jnp.maximum(h2 + b2_ref[...], 0.0)
    # dropout (eval mode) -> identity

    # fc3 (out_features == 1): VPU multiply + sublane (XLU) reduce instead of a
    # degenerate M=1 MXU matmul; b3 is an SMEM scalar.
    z = jnp.sum(h2 * w3_ref[...], axis=0, keepdims=True) + b3_ref[0, 0]
    o_ref[...] = jax.nn.sigmoid(z).astype(o_ref.dtype)


def _tile_config(max_block_b):
    """Generation-aware batch-tile cap and scoped-VMEM limit."""
    vmem_bytes = 64 * 1024 * 1024                   # conservative (v7x) default
    try:
        vmem_bytes = int(pltpu.get_tpu_info().vmem_capacity_bytes)
    except Exception:
        pass
    if vmem_bytes >= 96 * 1024 * 1024:              # v5e / v6e: 128 MiB physical
        cap, vmem_limit = 16384, 64 * 1024 * 1024
    else:                                           # v7x: 64 MiB physical
        cap, vmem_limit = 8192, 48 * 1024 * 1024
    if max_block_b is not None:
        cap = min(cap, max(128, _round_up(int(max_block_b), 128)))
    return cap, vmem_limit


def attack_model_10(x, params, *, max_block_b=None):
    """Fused AttackModel_10 forward. x: (B, 10) float32 -> (B, 1) float32."""
    B = x.shape[0]
    cap, vmem_limit = _tile_config(max_block_b)

    if B <= 512:
        # Single full-array block: no alignment constraints, no padding at all.
        tb = B
    else:
        # Multiple of 128 keeps output stores lane-dense; capping near B/2
        # guarantees >= 2 "parallel" grid steps so both v7x cores get work.
        tb = min(cap, _round_up(pl.cdiv(B, 2), 128))
    num_tiles = pl.cdiv(B, tb)

    w1 = params["w1"].astype(jnp.bfloat16)                  # (256, 10)
    w2 = params["w2"].astype(jnp.bfloat16)                  # (128, 256)
    b1 = params["b1"].reshape(-1, 1).astype(jnp.float32)    # (256, 1)
    b2 = params["b2"].reshape(-1, 1).astype(jnp.float32)    # (128, 1)
    w3 = params["w3"].reshape(-1, 1).astype(jnp.float32)    # (128, 1)
    b3 = params["b3"].reshape(1, 1).astype(jnp.float32)     # (1, 1)

    def resident(arr):
        # Constant block index across the grid -> stays VMEM-resident.
        return pl.BlockSpec(arr.shape, lambda i: (0,) * arr.ndim)

    flops = 2 * B * (10 * 256 + 256 * 128 + 128)
    bytes_accessed = (B * 10 * 4 + B * 4
                      + w1.size * 2 + w2.size * 2
                      + (b1.size + b2.size + w3.size + b3.size) * 4)

    out = pl.pallas_call(
        _mlp_kernel,
        out_shape=jax.ShapeDtypeStruct((1, B), jnp.float32),
        grid=(num_tiles,),
        in_specs=[
            pl.BlockSpec((tb, 10), lambda i: (i, 0)),            # x tile (pipelined)
            resident(w1), resident(b1),
            resident(w2), resident(b2),
            resident(w3),
            pl.BlockSpec(memory_space=pltpu.MemorySpace.SMEM),   # b3 scalar
        ],
        out_specs=pl.BlockSpec((1, tb), lambda i: (0, i)),       # lane-dense output
        compiler_params=pltpu.CompilerParams(
            dimension_semantics=("parallel",),
            vmem_limit_bytes=vmem_limit,
        ),
        cost_estimate=pl.CostEstimate(
            flops=flops, transcendentals=B, bytes_accessed=bytes_accessed),
    )(x.astype(jnp.float32), w1, b1, w2, b2, w3, b3)

    return out.reshape(B, 1)


def init_params(key):
    """PyTorch nn.Linear-style init: U(-1/sqrt(fan_in), +1/sqrt(fan_in))."""
    ks = jax.random.split(key, 6)

    def linear(kw, kb, fan_in, fan_out):
        bound = 1.0 / float(fan_in) ** 0.5
        w = jax.random.uniform(kw, (fan_out, fan_in), jnp.float32, -bound, bound)
        b = jax.random.uniform(kb, (fan_out,), jnp.float32, -bound, bound)
        return w, b

    w1, b1 = linear(ks[0], ks[1], 10, 256)
    w2, b2 = linear(ks[2], ks[3], 256, 128)
    w3, b3 = linear(ks[4], ks[5], 128, 1)
    return {"w1": w1, "b1": b1, "w2": w2, "b2": b2, "w3": w3, "b3": b3}


def _reference(x, p):
    h1 = jnp.maximum(x @ p["w1"].T + p["b1"], 0.0)
    h2 = jnp.maximum(h1 @ p["w2"].T + p["b2"], 0.0)
    return jax.nn.sigmoid(h2 @ p["w3"].T + p["b3"])


if __name__ == "__main__":
    key = jax.random.PRNGKey(0)
    k_x, k_p, k_x2 = jax.random.split(key, 3)
    params = init_params(k_p)

    # Primary small-shape check (single full-array block path).
    B = 8
    x = jax.random.normal(k_x, (B, 10), jnp.float32)
    out = jax.block_until_ready(attack_model_10(x, params))
    ref = _reference(x, params)
    assert out.shape == (B, 1), out.shape
    # bf16 matmul inputs with f32 accumulation: tolerance loosened vs f32 ref.
    assert jnp.allclose(out, ref, atol=1e-2, rtol=1e-2), "mismatch vs reference (B=8)"

    # Secondary check exercising the tiled path (>=2 tiles, partial last block).
    B2 = 640
    x2 = jax.random.normal(k_x2, (B2, 10), jnp.float32)
    out2 = jax.block_until_ready(attack_model_10(x2, params))
    ref2 = _reference(x2, params)
    assert out2.shape == (B2, 1), out2.shape
    assert jnp.allclose(out2, ref2, atol=1e-2, rtol=1e-2), "mismatch vs reference (B=640)"

    print("KERNEL_OK")
</pallas_src>

<mosaic_0001>
module attributes {stable_mosaic.version = 11 : i64} {
  func.func @_mlp_kernel(%arg0: i32, %arg1: memref<8x10xf32, #tpu.memory_space<vmem>>, %arg2: memref<256x10xbf16, #tpu.memory_space<vmem>>, %arg3: memref<256x1xf32, #tpu.memory_space<vmem>>, %arg4: memref<128x256xbf16, #tpu.memory_space<vmem>>, %arg5: memref<128x1xf32, #tpu.memory_space<vmem>>, %arg6: memref<128x1xf32, #tpu.memory_space<vmem>>, %arg7: memref<1x1xf32, #tpu.memory_space<smem>>, %arg8: memref<1x8xf32, #tpu.memory_space<vmem>>) attributes {dimension_semantics = [#tpu.dimension_semantics<parallel>], iteration_bounds = array<i64: 1>, scalar_prefetch = 0 : i64, scratch_operands = 0 : i64, tpu.core_type = #tpu.core_type<tc>, window_params = [{transform_indices = @transform_0, window_bounds = array<i64: 8, 10>}, {pipeline_mode = #tpu.pipeline_mode<synchronous>, transform_indices = @transform_1, window_bounds = array<i64: 256, 10>}, {pipeline_mode = #tpu.pipeline_mode<synchronous>, transform_indices = @transform_2, window_bounds = array<i64: 256, 1>}, {pipeline_mode = #tpu.pipeline_mode<synchronous>, transform_indices = @transform_3, window_bounds = array<i64: 128, 256>}, {pipeline_mode = #tpu.pipeline_mode<synchronous>, transform_indices = @transform_4, window_bounds = array<i64: 128, 1>}, {pipeline_mode = #tpu.pipeline_mode<synchronous>, transform_indices = @transform_5, window_bounds = array<i64: 128, 1>}, {transform_indices = @transform_6, window_bounds = array<i64: 1, 1>}, {transform_indices = @transform_7, window_bounds = array<i64: 1, 8>}]} {
    %c0 = arith.constant 0 : index
    %c0_0 = arith.constant 0 : index
    %0 = vector.load %arg1[%c0, %c0_0] : memref<8x10xf32, #tpu.memory_space<vmem>>, vector<8x10xf32>
    %1 = arith.truncf %0 : vector<8x10xf32> to vector<8x10xbf16>
    %c0_1 = arith.constant 0 : index
    %c0_2 = arith.constant 0 : index
    %2 = vector.load %arg2[%c0_1, %c0_2] : memref<256x10xbf16, #tpu.memory_space<vmem>>, vector<256x10xbf16>
    %cst = arith.constant dense<0.000000e+00> : vector<256x8xf32>
    %3 = tpu.matmul %2, %1, %cst {dimension_numbers = #tpu.dot_dimension_numbers<[1], [1], [0], [0], [0, 0, 1, 0], [], []>} : vector<256x10xbf16>, vector<8x10xbf16>, vector<256x8xf32> -> vector<256x8xf32>
    %c0_3 = arith.constant 0 : index
    %c0_4 = arith.constant 0 : index
    %4 = vector.load %arg3[%c0_3, %c0_4] : memref<256x1xf32, #tpu.memory_space<vmem>>, vector<256x1xf32>
    %5 = vector.broadcast %4 : vector<256x1xf32> to vector<256x8xf32>
    %6 = arith.addf %3, %5 : vector<256x8xf32>
    %cst_5 = arith.constant 0.000000e+00 : f32
    %7 = vector.broadcast %cst_5 : f32 to vector<256x8xf32>
    %8 = arith.maximumf %6, %7 : vector<256x8xf32>
    %9 = arith.truncf %8 : vector<256x8xf32> to vector<256x8xbf16>
    %c0_6 = arith.constant 0 : index
    %c0_7 = arith.constant 0 : index
    %10 = vector.load %arg4[%c0_6, %c0_7] : memref<128x256xbf16, #tpu.memory_space<vmem>>, vector<128x256xbf16>
    %cst_8 = arith.constant dense<0.000000e+00> : vector<128x8xf32>
    %11 = tpu.matmul %10, %9, %cst_8 {dimension_numbers = #tpu.dot_dimension_numbers<[1], [0], [0], [1], [0, 0, 1, 1], [], []>} : vector<128x256xbf16>, vector<256x8xbf16>, vector<128x8xf32> -> vector<128x8xf32>
    %c0_9 = arith.constant 0 : index
    %c0_10 = arith.constant 0 : index
    %12 = vector.load %arg5[%c0_9, %c0_10] : memref<128x1xf32, #tpu.memory_space<vmem>>, vector<128x1xf32>
    %13 = vector.broadcast %12 : vector<128x1xf32> to vector<128x8xf32>
    %14 = arith.addf %11, %13 : vector<128x8xf32>
    %cst_11 = arith.constant 0.000000e+00 : f32
    %15 = vector.broadcast %cst_11 : f32 to vector<128x8xf32>
    %16 = arith.maximumf %14, %15 : vector<128x8xf32>
    %c0_12 = arith.constant 0 : index
    %c0_13 = arith.constant 0 : index
    %17 = vector.load %arg6[%c0_12, %c0_13] : memref<128x1xf32, #tpu.memory_space<vmem>>, vector<128x1xf32>
    %18 = vector.broadcast %17 : vector<128x1xf32> to vector<128x8xf32>
    %19 = arith.mulf %16, %18 : vector<128x8xf32>
    %cst_14 = arith.constant dense<0.000000e+00> : vector<8xf32>
    %20 = vector.multi_reduction <add>, %19, %cst_14 [0] : vector<128x8xf32> to vector<8xf32>
    %21 = vector.shape_cast %20 : vector<8xf32> to vector<1x8xf32>
    %c0_15 = arith.constant 0 : index
    %c0_16 = arith.constant 0 : index
    %22 = memref.load %arg7[%c0_15, %c0_16] : memref<1x1xf32, #tpu.memory_space<smem>>
    %23 = vector.broadcast %22 : f32 to vector<1x8xf32>
    %24 = arith.addf %21, %23 : vector<1x8xf32>
    %25 = arith.negf %24 : vector<1x8xf32>
    %26 = math.exp %25 : vector<1x8xf32>
    %cst_17 = arith.constant 1.000000e+00 : f32
    %27 = vector.broadcast %cst_17 : f32 to vector<1x8xf32>
    %28 = arith.addf %27, %26 : vector<1x8xf32>
    %29 = arith.divf %27, %28 : vector<1x8xf32>
    %c0_18 = arith.constant 0 : index
    %c0_19 = arith.constant 0 : index
    %30 = vector.load %arg8[%c0_18, %c0_19] : memref<1x8xf32, #tpu.memory_space<vmem>>, vector<1x8xf32>
    tpu.vector_store %arg8[%c0_18, %c0_19], %29 {strides = array<i32>} : memref<1x8xf32, #tpu.memory_space<vmem>>, vector<1x8xf32>,
    return
  }
  func.func @transform_0(%arg0: i32) -> (i32, i32) {
    %c0_i32 = arith.constant 0 : i32
    %c0_i32_0 = arith.constant 0 : i32
    return %arg0, %c0_i32 : i32, i32
  }
  func.func @transform_1(%arg0: i32) -> (i32, i32) {
    %c0_i32 = arith.constant 0 : i32
    %c0_i32_0 = arith.constant 0 : i32
    %c0_i32_1 = arith.constant 0 : i32
    return %c0_i32, %c0_i32_0 : i32, i32
  }
  func.func @transform_2(%arg0: i32) -> (i32, i32) {
    %c0_i32 = arith.constant 0 : i32
    %c0_i32_0 = arith.constant 0 : i32
    %c0_i32_1 = arith.constant 0 : i32
    return %c0_i32, %c0_i32_0 : i32, i32
  }
  func.func @transform_3(%arg0: i32) -> (i32, i32) {
    %c0_i32 = arith.constant 0 : i32
    %c0_i32_0 = arith.constant 0 : i32
    %c0_i32_1 = arith.constant 0 : i32
    return %c0_i32, %c0_i32_0 : i32, i32
  }
  func.func @transform_4(%arg0: i32) -> (i32, i32) {
    %c0_i32 = arith.constant 0 : i32
    %c0_i32_0 = arith.constant 0 : i32
    %c0_i32_1 = arith.constant 0 : i32
    return %c0_i32, %c0_i32_0 : i32, i32
  }
  func.func @transform_5(%arg0: i32) -> (i32, i32) {
    %c0_i32 = arith.constant 0 : i32
    %c0_i32_0 = arith.constant 0 : i32
    %c0_i32_1 = arith.constant 0 : i32
    return %c0_i32, %c0_i32_0 : i32, i32
  }
  func.func @transform_6(%arg0: i32) -> (i32, i32) {
    %c0_i32 = arith.constant 0 : i32
    %c0_i32_0 = arith.constant 0 : i32
    %c0_i32_1 = arith.constant 0 : i32
    return %c0_i32, %c0_i32_0 : i32, i32
  }
  func.func @transform_7(%arg0: i32) -> (i32, i32) {
    %c0_i32 = arith.constant 0 : i32
    %c0_i32_0 = arith.constant 0 : i32
    return %c0_i32, %arg0 : i32, i32
  }
}

</mosaic_0001>

<bundles_post_ra>
// kernel: tpu_custom_call.1
= control target key start
LH: loop header
LB: loop body
LE: loop exit
PB: predicated region body
PF: predicated region fallthrough
CT: control target
= control target key end

     0   :  { %v1233_v3 = vmov 0   ;;  %vm335_vm0 = vcmask 80896   ;;  %s1755_s0 = inlined_call_operand.vmem [shape: f32[8,10], index: 0, kind: input, shape index: {}]   ;;  %s1756_s1 = inlined_call_operand.vmem [shape: bf16[256,10], index: 1, kind: input, shape index: {}]   ;;  %s1757_s2 = inlined_call_operand.vmem [shape: f32[256,1], index: 2, kind: input, shape index: {}]   ;;  %s1758_s3 = inlined_call_operand.vmem [shape: bf16[128,256], index: 3, kind: input, shape index: {}]   ;;  %s1759_s4 = inlined_call_operand.vmem [shape: f32[128,1], index: 4, kind: input, shape index: {}]   ;;  %s1760_s5 = inlined_call_operand.vmem [shape: f32[128,1], index: 5, kind: input, shape index: {}]   ;;  %s1761_s6 = inlined_call_operand.<no memory space> [shape: f32[1,1], index: 6, kind: input, shape index: {}]   ;;  %s1762_s7 = inlined_call_operand.hbm [shape: f32[1,8], index: 7, kind: output, shape index: {}]  }
   0x1   :  { %v93_v0 = vld [vmem:[%s1757_s2 + $0xf0] sm:$0xff]  ;;  %v91_v1 = vld [vmem:[%s1757_s2 + $0xe0] sm:$0xff]  ;;  %1202 = vset.pattern.permute.xlu2 %v1233_v3  ;;  %1201 = vset.pattern.permute.xlu1 %v1233_v3  ;;  %v94_v7 = vld [vmem:[%s1757_s2 + $0xf8] sm:$0xff] }
   0x2   :  { %v77_v2 = vld [vmem:[%s1757_s2 + $0x70] sm:$0xff]  ;;  %v29_v4 = vld [vmem:[%s1755_s0] sm:$0xff]  ;;  %1200 = vset.pattern.permute.xlu0 %v1233_v3  ;;  %237 = vperm.xlu2 %1202, %v91_v1   ;;  %v92_v8 = vld [vmem:[%s1757_s2 + $0xe8] sm:$0xff] }
   0x3   :  { %v30_v5 = vpack.c.bf16 %v29_v4, %v29_v4  ;;  %247 = vperm.xlu0 %1200, %v93_v0   ;;  %167 = vperm.xlu1 %1201, %v77_v2  }
   0x5   :  { %v385_v6 = vsel %vm335_vm0, %v30_v5, 0 }
   0x6   :  { %394 = vmatpush.bf16.xpose.msra.mxu0 %v385_v6  ;;  %1197 = vmatpush.bf16.xpose.msra.mxu3 %v385_v6 }
   0x7   :  { %13 = vsyncpa [#allocation4], 0  ;;  %v78_v9 = vld [vmem:[%s1757_s2 + $0x78] sm:$0xff]  ;;  %v1165_v10 = vld [vmem:[%s1756_s1] sm:$0xff]  ;;  %vm942_vm1 = vcmask 64512   ;;  %s1234_s21 = smov [#allocation3]  }
   0x8   :  { %v1174_v11 = vld [vmem:[%s1756_s1 + $0x48] sm:$0xff]  ;;  %v89_v12 = vld [vmem:[%s1757_s2 + $0xd0] sm:$0xff]  ;;  %v75_v14 = vld [vmem:[%s1757_s2 + $0x60] sm:$0xff]  ;;  %s1009_s22 = sshll.u32 %s1234_s21, 4  ;;  %vm1002_vm5 = vcmask 57344   ;;  %s1010_s22 = int_to_ptr.vmem [resolvable:$true] %s1009_s22 }
   0x9   :  { %v76_v13 = vld [vmem:[%s1757_s2 + $0x68] sm:$0xff]  ;;  %v90_v15 = vld [vmem:[%s1757_s2 + $0xd8] sm:$0xff]  ;;  %v73_v17 = vld [vmem:[%s1757_s2 + $0x50] sm:$0xff] }
   0xa   :  { %242 = vperm.xlu2 %1202, %v92_v8   ;;  %v74_v16 = vld [vmem:[%s1757_s2 + $0x58] sm:$0xff]  ;;  %v1166_v18 = vld [vmem:[%s1756_s1 + $0x8] sm:$0xff]  ;;  %v1175_v19 = vld [vmem:[%s1756_s1 + $0x50] sm:$0xff] }
   0xb   :  { %252 = vperm.xlu0 %1200, %v94_v7   ;;  %172 = vperm.xlu1 %1201, %v78_v9   ;;  %v71_v20 = vld [vmem:[%s1757_s2 + $0x40] sm:$0xff]  ;;  %v88_v22 = vld [vmem:[%s1757_s2 + $0xc8] sm:$0xff]  ;;  %v85_v23 = vld [vmem:[%s1757_s2 + $0xb0] sm:$0xff] }
   0xc   :  { %v87_v21 = vld [vmem:[%s1757_s2 + $0xc0] sm:$0xff]  ;;  %v86_v24 = vld [vmem:[%s1757_s2 + $0xb8] sm:$0xff]  ;;  %v72_v25 = vld [vmem:[%s1757_s2 + $0x48] sm:$0xff] }
   0xd   :  { %1084 = vmatmul.msk.bf16.vlgmr.msra.gmra.mxu0 %vm335_vm0, %v1165_v10  ;;  %1093 = vmatmul.msk.bf16.vlgmr.msra.gmra.mxu3 %vm335_vm0, %v1174_v11  ;;  %v1167_v26 = vld [vmem:[%s1756_s1 + $0x10] sm:$0xff]  ;;  %v1176_v27 = vld [vmem:[%s1756_s1 + $0x58] sm:$0xff]  ;;  %v83_v28 = vld [vmem:[%s1757_s2 + $0xa0] sm:$0xff] }
   0xe   :  { %v70_v29 = vld [vmem:[%s1757_s2 + $0x38] sm:$0xff]  ;;  %v69_v30 = vld [vmem:[%s1757_s2 + $0x30] sm:$0xff]  ;;  %v84_v31 = vld [vmem:[%s1757_s2 + $0xa8] sm:$0xff] }
   0xf   :  { %v68_v32 = vld [vmem:[%s1757_s2 + $0x28] sm:$0xff]  ;;  %v67_v33 = vld [vmem:[%s1757_s2 + $0x20] sm:$0xff]  ;;  %v1168_v34 = vld [vmem:[%s1756_s1 + $0x18] sm:$0xff] }
  0x10   :  { %v1177_v35 = vld [vmem:[%s1756_s1 + $0x60] sm:$0xff]  ;;  %v65_v36 = vld [vmem:[%s1757_s2 + $0x10] sm:$0xff]  ;;  %v82_v38 = vld [vmem:[%s1757_s2 + $0x98] sm:$0xff] }
  0x11   :  { %v81_v37 = vld [vmem:[%s1757_s2 + $0x90] sm:$0xff]  ;;  %v79_v39 = vld [vmem:[%s1757_s2 + $0x80] sm:$0xff]  ;;  %v80_v40 = vld [vmem:[%s1757_s2 + $0x88] sm:$0xff] }
  0x12   :  { %227 = vperm.xlu2 %1202, %v89_v12   ;;  %v66_v41 = vld [vmem:[%s1757_s2 + $0x18] sm:$0xff]  ;;  %v1169_v42 = vld [vmem:[%s1756_s1 + $0x20] sm:$0xff]  ;;  %v1178_v43 = vld [vmem:[%s1756_s1 + $0x68] sm:$0xff] }
  0x13   :  { %162 = vperm.xlu1 %1201, %v76_v13   ;;  %157 = vperm.xlu0 %1200, %v75_v14   ;;  %v540_v44 = vld [vmem:[%s1759_s4] sm:$0xff]  ;;  %v64_v45 = vld [vmem:[%s1757_s2 + $0x8] sm:$0xff]  ;;  %v543_v47 = vld [vmem:[%s1759_s4 + $0x18] sm:$0xff] }
  0x14   :  { %v63_v46 = vld [vmem:[%s1757_s2] sm:$0xff]  ;;  %v542_v48 = vld [vmem:[%s1759_s4 + $0x10] sm:$0xff]  ;;  %v541_v49 = vld [vmem:[%s1759_s4 + $0x8] sm:$0xff] }
  0x15   :  { %v1170_v50 = vld [vmem:[%s1756_s1 + $0x28] sm:$0xff]  ;;  %v1179_v51 = vld [vmem:[%s1756_s1 + $0x70] sm:$0xff]  ;;  %v544_v54 = vld [vmem:[%s1759_s4 + $0x20] sm:$0xff] }
  0x16   :  { %v546_v52 = vld [vmem:[%s1759_s4 + $0x30] sm:$0xff]  ;;  %v545_v53 = vld [vmem:[%s1759_s4 + $0x28] sm:$0xff]  ;;  %v548_v56 = vld [vmem:[%s1759_s4 + $0x40] sm:$0xff] }
  0x17   :  { %v549_v55 = vld [vmem:[%s1759_s4 + $0x48] sm:$0xff]  ;;  %v547_v58 = vld [vmem:[%s1759_s4 + $0x38] sm:$0xff]  ;;  %v1171_v59 = vld [vmem:[%s1756_s1 + $0x30] sm:$0xff] }
  0x18   :  { %v1180_v60 = vld [vmem:[%s1756_s1 + $0x78] sm:$0xff]  ;;  %v552_v61 = vld [vmem:[%s1759_s4 + $0x60] sm:$0xff]  ;;  %v550_v63 = vld [vmem:[%s1759_s4 + $0x50] sm:$0xff] }
  0x19   :  { %v551_v62 = vld [vmem:[%s1759_s4 + $0x58] sm:$0xff]  ;;  %v832_v3 = vld [vmem:[%s1760_s5 + $0x10] sm:$0xff]  ;;  %v831_v4 = vld [vmem:[%s1760_s5 + $0x8] sm:$0xff] }
  0x1a   :  { %152 = vperm.xlu2 %1202, %v74_v16   ;;  %v830_v5 = vld [vmem:[%s1760_s5] sm:$0xff]  ;;  %v1172_v6 = vld [vmem:[%s1756_s1 + $0x38] sm:$0xff]  ;;  %v835_v10 = vld [vmem:[%s1760_s5 + $0x28] sm:$0xff] }
  0x1b   :  { %232 = vperm.xlu0 %1200, %v90_v15   ;;  %147 = vperm.xlu1 %1201, %v73_v17   ;;  %v834_v11 = vld [vmem:[%s1760_s5 + $0x20] sm:$0xff]  ;;  %v833_v12 = vld [vmem:[%s1760_s5 + $0x18] sm:$0xff] }
  0x1c   :  { %v838_v16 = vld [vmem:[%s1760_s5 + $0x40] sm:$0xff]  ;;  %v837_v17 = vld [vmem:[%s1760_s5 + $0x38] sm:$0xff] }
  0x1d   :  { %1085 = vmatmul.msk.bf16.gmra.mxu0 %vm335_vm0, %v1166_v18  ;;  %1094 = vmatmul.msk.bf16.gmra.mxu3 %vm335_vm0, %v1175_v19  ;;  %v836_v18 = vld [vmem:[%s1760_s5 + $0x30] sm:$0xff]  ;;  %v1173_v19 = vld [vmem:[%s1756_s1 + $0x40] sm:$0xff] }
  0x22   :  { %137 = vperm.xlu2 %1202, %v71_v20  }
  0x23   :  { %217 = vperm.xlu0 %1200, %v87_v21   ;;  %222 = vperm.xlu1 %1201, %v88_v22  }
  0x2a   :  { %212 = vperm.xlu2 %1202, %v86_v24   ;;  %v840_v24 = vld [vmem:[%s1760_s5 + $0x50] sm:$0xff] }
  0x2b   :  { %207 = vperm.xlu1 %1201, %v85_v23   ;;  %142 = vperm.xlu0 %1200, %v72_v25  }
  0x2d   :  { %1086 = vmatmul.msk.bf16.gmra.mxu0 %vm335_vm0, %v1167_v26  ;;  %1095 = vmatmul.msk.bf16.gmra.mxu3 %vm335_vm0, %v1176_v27  ;;  %v553_v26 = vld [vmem:[%s1759_s4 + $0x68] sm:$0xff] }
  0x2e   :  { %v839_v27 = vld [vmem:[%s1760_s5 + $0x48] sm:$0xff] }
  0x32   :  { %197 = vperm.xlu2 %1202, %v83_v28  }
  0x33   :  { %132 = vperm.xlu1 %1201, %v70_v29   ;;  %127 = vperm.xlu0 %1200, %v69_v30  }
  0x3a   :  { %122 = vperm.xlu2 %1202, %v68_v32   ;;  %v555_v32 = vld [vmem:[%s1759_s4 + $0x78] sm:$0xff] }
  0x3b   :  { %202 = vperm.xlu0 %1200, %v84_v31   ;;  %117 = vperm.xlu1 %1201, %v67_v33   ;;  %v841_v33 = vld [vmem:[%s1760_s5 + $0x58] sm:$0xff] }
  0x3d   :  { %1087 = vmatmul.msk.bf16.gmra.mxu0 %vm335_vm0, %v1168_v34  ;;  %1096 = vmatmul.msk.bf16.gmra.mxu3 %vm335_vm0, %v1177_v35  ;;  %v554_v34 = vld [vmem:[%s1759_s4 + $0x70] sm:$0xff] }
  0x42   :  { %107 = vperm.xlu2 %1202, %v65_v36  }
  0x43   :  { %187 = vperm.xlu0 %1200, %v81_v37   ;;  %192 = vperm.xlu1 %1201, %v82_v38  }
  0x4a   :  { %182 = vperm.xlu2 %1202, %v80_v40   ;;  %v844_v40 = vld [vmem:[%s1760_s5 + $0x70] sm:$0xff] }
  0x4b   :  { %177 = vperm.xlu1 %1201, %v79_v39   ;;  %112 = vperm.xlu0 %1200, %v66_v41   ;;  %v843_v41 = vld [vmem:[%s1760_s5 + $0x68] sm:$0xff] }
  0x4d   :  { %1088 = vmatmul.msk.bf16.gmra.mxu0 %vm335_vm0, %v1169_v42  ;;  %1097 = vmatmul.msk.bf16.gmra.mxu3 %vm335_vm0, %v1178_v43  ;;  %v842_v42 = vld [vmem:[%s1760_s5 + $0x60] sm:$0xff] }
  0x52   :  { %558 = vperm.xlu2 %1202, %v540_v44  }
  0x53   :  { %102 = vperm.xlu1 %1201, %v64_v45   ;;  %97 = vperm.xlu0 %1200, %v63_v46  }
  0x5a   :  { %573 = vperm.xlu2 %1202, %v543_v47  }
  0x5b   :  { %568 = vperm.xlu1 %1201, %v542_v48   ;;  %563 = vperm.xlu0 %1200, %v541_v49   ;;  %v845_v48 = vld [vmem:[%s1760_s5 + $0x78] sm:$0xff] }
  0x5c   :  { %v1450_v57 = vpop.permute.xlu2 %237 }
  0x5d   :  { %1089 = vmatmul.msk.bf16.gmra.mxu0 %vm335_vm0, %v1170_v50  ;;  %1098 = vmatmul.msk.bf16.gmra.mxu3 %vm335_vm0, %v1179_v51 }
  0x62   :  { %588 = vperm.xlu2 %1202, %v546_v52  }
  0x63   :  { %583 = vperm.xlu1 %1201, %v545_v53   ;;  %578 = vperm.xlu0 %1200, %v544_v54  }
  0x64   :  { %v1472_v0 = vpop.permute.xlu2 %242 }
  0x6a   :  { %603 = vperm.xlu2 %1202, %v549_v55  }
  0x6b   :  { %598 = vperm.xlu1 %1201, %v548_v56   ;;  %593 = vperm.xlu0 %1200, %v547_v58  }
  0x6c   :  { %v1490_v7 = vpop.permute.xlu2 %227 }
  0x6d   :  { %1090 = vmatmul.msk.bf16.gmra.mxu0 %vm335_vm0, %v1171_v59  ;;  %1099 = vmatmul.msk.bf16.gmra.mxu3 %vm335_vm0, %v1180_v60 }
  0x72   :  { %618 = vperm.xlu2 %1202, %v552_v61  }
  0x73   :  { %613 = vperm.xlu1 %1201, %v551_v62   ;;  %608 = vperm.xlu0 %1200, %v550_v63  }
  0x74   :  { %v1510_v15 = vpop.permute.xlu2 %152 }
  0x75   :  { %v1474_v1 = vpop.permute.xlu0 %247  ;;  %v1476_v2 = vpop.permute.xlu1 %167 }
  0x7a   :  { %858 = vperm.xlu2 %1202, %v832_v3  }
  0x7b   :  { %853 = vperm.xlu1 %1201, %v831_v4   ;;  %848 = vperm.xlu0 %1200, %v830_v5  }
  0x7c   :  { %v1534_v25 = vpop.permute.xlu2 %137 }
  0x7d   :  { %1091 = vmatmul.msk.bf16.gmra.mxu0 %vm335_vm0, %v1172_v6  ;;  %v1493_v8 = vpop.permute.xlu0 %252  ;;  %v1495_v9 = vpop.permute.xlu1 %172 }
  0x82   :  { %873 = vperm.xlu2 %1202, %v835_v10  }
  0x83   :  { %868 = vperm.xlu1 %1201, %v834_v11   ;;  %863 = vperm.xlu0 %1200, %v833_v12  }
  0x84   :  { %v213_v36 = vpop.permute.xlu2 %212 }
  0x85   :  { %v1506_v13 = vpop.permute.xlu1 %162  ;;  %v1508_v14 = vpop.permute.xlu0 %157 }
  0x8a   :  { %v1524_v20 = vpop.f32.mrf.mxu0  ;;  %888 = vperm.xlu2 %1202, %v838_v16  }
  0x8b   :  { %883 = vperm.xlu1 %1201, %v837_v17   ;;  %878 = vperm.xlu0 %1200, %v836_v18  }
  0x8c   :  { %v198_v44 = vpop.permute.xlu2 %197 }
  0x8d   :  { %1092 = vmatmul.msk.bf16.gmra.mxu0 %vm335_vm0, %v1173_v19  ;;  %v1527_v21 = vpop.permute.xlu0 %232  ;;  %v1529_v22 = vpop.permute.xlu1 %147 }
  0x90   :  { %v441_v23 = vpop.f32.mrf.mxu3 }
  0x92   :  { %v1542_v28 = vpop.f32.mrf.mxu0  ;;  %898 = vperm.xlu2 %1202, %v840_v24  }
  0x93   :  { %623 = vperm.xlu1 %1201, %v553_v26   ;;  %893 = vperm.xlu0 %1200, %v839_v27  }
  0x94   :  { %v123_v54 = vpop.permute.xlu2 %122 }
  0x95   :  { %v1544_v29 = vpop.permute.xlu0 %217  ;;  %v1546_v30 = vpop.permute.xlu1 %222 }
  0x98   :  { %v443_v31 = vpop.f32.mrf.mxu3 }
  0x9a   :  { %v401_v35 = vpop.f32.mrf.mxu0  ;;  %633 = vperm.xlu2 %1202, %v555_v32  }
  0x9b   :  { %903 = vperm.xlu1 %1201, %v841_v33   ;;  %628 = vperm.xlu0 %1200, %v554_v34  }
  0x9c   :  { %v108_v24 = vpop.permute.xlu2 %107 }
  0x9d   :  { %v208_v37 = vpop.permute.xlu1 %207  ;;  %v1557_v38 = vpop.permute.xlu0 %142  ;;  %v402_v34 = vadd.f32 %v401_v35, %v108_v24 }
  0xa0   :  { %v446_v39 = vpop.f32.mrf.mxu3 }
  0xa1   :  { %v447_v50 = vadd.f32 %v446_v39, %v198_v44 }
  0xa2   :  { %v403_v43 = vpop.f32.mrf.mxu0  ;;  %918 = vperm.xlu2 %1202, %v844_v40  }
  0xa3   :  { %913 = vperm.xlu1 %1201, %v843_v41   ;;  %908 = vperm.xlu0 %1200, %v842_v42   ;;  %v496_v56 = vmax.f32 %v447_v50, 0.0  ;;  %v478_v41 = vmax.f32 %v402_v34, 0.0 }
  0xa5   :  { %v133_v45 = vpop.permute.xlu1 %132  ;;  %v128_v46 = vpop.permute.xlu0 %127 }
  0xa8   :  { %v448_v47 = vpop.f32.mrf.mxu3 }
  0xaa   :  { %v406_v49 = vpop.f32.mrf.mxu0 }
  0xab   :  { %923 = vperm.xlu0 %1200, %v845_v48  }
  0xad   :  { %v203_v51 = vpop.permute.xlu0 %202  ;;  %v118_v52 = vpop.permute.xlu1 %117 }
  0xae   :  { %v449_v53 = vadd.f32 %v448_v47, %v203_v51  ;;  %v407_v59 = vadd.f32 %v406_v49, %v118_v52 }
  0xb0   :  { %v451_v55 = vpop.f32.mrf.mxu3  ;;  %v497_v58 = vmax.f32 %v449_v53, 0.0  ;;  %v480_v63 = vmax.f32 %v407_v59, 0.0 }
  0xb1   :  { %v452_v6 = vadd.f32 %v451_v55, %v208_v37 }
  0xb2   :  { %v408_v60 = vpop.f32.mrf.mxu0  ;;  %v1571_v62 = vpack.c.bf16 %v497_v58, %v496_v56 }
  0xb3   :  { %v409_v61 = vadd.f32 %v408_v60, %v123_v54  ;;  %v498_v27 = vmax.f32 %v452_v6, 0.0 }
  0xb5   :  { %v481_v3 = vmax.f32 %v409_v61, 0.0  ;;  %v188_v4 = vpop.permute.xlu0 %187  ;;  %v193_v5 = vpop.permute.xlu1 %192 }
  0xb6   :  { %v442_v10 = vadd.f32 %v441_v23, %v188_v4  ;;  %v444_v11 = vadd.f32 %v443_v31, %v193_v5 }
  0xb7   :  { %v1573_v12 = vpack.c.bf16 %v481_v3, %v480_v63 }
  0xb8   :  { %v453_v16 = vpop.f32.mrf.mxu3  ;;  %v494_v17 = vmax.f32 %v442_v10, 0.0  ;;  %v495_v18 = vmax.f32 %v444_v11, 0.0 }
  0xb9   :  { %v454_v19 = vadd.f32 %v453_v16, %v213_v36 }
  0xba   :  { %v411_v26 = vpop.f32.mrf.mxu0  ;;  %v1575_v33 = vpack.c.bf16 %v495_v18, %v494_v17 }
  0xbb   :  { %v499_v32 = vmax.f32 %v454_v19, 0.0  ;;  %v412_v42 = vadd.f32 %v411_v26, %v128_v46 }
  0xbd   :  { %v1577_v39 = vpack.c.bf16 %v499_v32, %v498_v27  ;;  %v1579_v40 = vpop.permute.xlu1 %177  ;;  %v113_v37 = vpop.permute.xlu0 %112  ;;  %v482_v49 = vmax.f32 %v412_v42, 0.0 }
  0xbe   :  { %v404_v23 = vadd.f32 %v403_v43, %v113_v37 }
  0xc0   :  { %v456_v31 = vpop.f32.mrf.mxu3  ;;  %v479_v44 = vmax.f32 %v404_v23, 0.0 }
  0xc1   :  { %v457_v42 = vadd.f32 %v456_v31, %v1544_v29 }
  0xc2   :  { %v413_v47 = vpop.f32.mrf.mxu0  ;;  %v1581_v36 = vpack.c.bf16 %v479_v44, %v478_v41 }
  0xc3   :  { %v414_v48 = vadd.f32 %v413_v47, %v133_v45 }
  0xc5   :  { %v483_v50 = vmax.f32 %v414_v48, 0.0  ;;  %v103_v51 = vpop.permute.xlu1 %102  ;;  %v98_v52 = vpop.permute.xlu0 %97 }
  0xc6   :  { %v399_v35 = vadd.f32 %v1542_v28, %v103_v51  ;;  %v397_v53 = vadd.f32 %v1524_v20, %v98_v52 }
  0xc7   :  { %v1585_v54 = vpack.c.bf16 %v483_v50, %v482_v49 }
  0xc8   :  { %v458_v55 = vpop.f32.mrf.mxu3  ;;  %v477_v43 = vmax.f32 %v399_v35, 0.0  ;;  %v476_v56 = vmax.f32 %v397_v53, 0.0 }
  0xca   :  { %v416_v58 = vpop.f32.mrf.mxu0  ;;  %v1587_v46 = vpack.c.bf16 %v477_v43, %v476_v56 }
  0xd0   :  { %v461_v59 = vpop.f32.mrf.mxu3 }
  0xd1   :  { %v462_v34 = vadd.f32 %v461_v59, %v1490_v7 }
  0xd2   :  { %v418_v45 = vpop.f32.mrf.mxu0 }
  0xd8   :  { %v463_v60 = vpop.f32.mrf.mxu3 }
  0xd9   :  { %v464_v26 = vadd.f32 %v463_v60, %v1527_v21 }
  0xda   :  { %v421_v61 = vpop.f32.mrf.mxu0 }
  0xdb   :  { %v503_v23 = vmax.f32 %v464_v26, 0.0  ;;  %v422_v29 = vadd.f32 %v421_v61, %v1529_v22  ;;  %v183_v22 = vpop.permute.xlu2 %182  ;;  %v1126_v26 = vld [vmem:[%s1758_s3 + $0x30] sm:$0xf] }
  0xdd   :  { %v486_v43 = vmax.f32 %v422_v29, 0.0 }
  0xe0   :  { %v466_v63 = vpop.f32.mrf.mxu3 }
  0xe1   :  { %v467_v18 = vadd.f32 %v466_v63, %v1450_v57  ;;  %v502_v57 = vmax.f32 %v462_v34, 0.0  ;;  %v1189_v34 = vld [vmem:[%s1758_s3 + $0x44] sm:$0xf] }
  0xe2   :  { %v423_v3 = vpop.f32.mrf.mxu0 }
  0xe3   :  { %v504_v37 = vmax.f32 %v467_v18, 0.0  ;;  %v521_v50 = vpack.c.bf16 %v503_v23, %v502_v57  ;;  %v424_v51 = vadd.f32 %v423_v3, %v1510_v15  ;;  %v1187_v18 = vld [vmem:[%s1758_s3 + $0x34] sm:$0xf]  ;;  %v1134_v23 = vld [vmem:[%s1758_s3 + $0x40] sm:$0xf]  ;;  %v559_v29 = vpop.permute.xlu2 %558 }
  0xe5   :  { %v487_v53 = vmax.f32 %v424_v51, 0.0 }
  0xe7   :  { %v513_v15 = vpack.c.bf16 %v487_v53, %v486_v43  ;;  %v1196_v53 = vld [vmem:[%s1758_s3 + $0x74] sm:$0xf0] }
  0xe8   :  { %v468_v4 = vpop.f32.mrf.mxu3 }
  0xe9   :  { %v469_v11 = vadd.f32 %v468_v4, %v1472_v0 }
  0xea   :  { %v426_v5 = vpop.f32.mrf.mxu0 }
  0xeb   :  { %v505_v27 = vmax.f32 %v469_v11, 0.0  ;;  %v427_v7 = vadd.f32 %v426_v5, %v1508_v14  ;;  %v1110_v5 = vld [vmem:[%s1758_s3 + $0x10] sm:$0xf]  ;;  %v1118_v11 = vld [vmem:[%s1758_s3 + $0x20] sm:$0xf] }
  0xed   :  { %v522_v41 = vpack.c.bf16 %v505_v27, %v504_v37  ;;  %v488_v31 = vmax.f32 %v427_v7, 0.0  ;;  %v1188_v27 = vld [vmem:[%s1758_s3 + $0x34] sm:$0xf0]  ;;  %v1136_v37 = vld [vmem:[%s1758_s3 + $0x48] sm:$0xf0] }
  0xee   :  { %v1193_v7 = vld [vmem:[%s1758_s3 + $0x64] sm:$0xf] }
  0xf0   :  { %v471_v6 = vpop.f32.mrf.mxu3 }
  0xf1   :  { %v472_v20 = vadd.f32 %v471_v6, %v1474_v1  ;;  %v459_v1 = vadd.f32 %v458_v55, %v1546_v30  ;;  %v500_v30 = vmax.f32 %v457_v42, 0.0  ;;  %v417_v55 = vadd.f32 %v416_v58, %v1534_v25  ;;  %v1181_v25 = vld [vmem:[%s1758_s3 + $0x4] sm:$0xf]  ;;  %v1184_v6 = vld [vmem:[%s1758_s3 + $0x14] sm:$0xf0] }
  0xf2   :  { %v428_v28 = vpop.f32.mrf.mxu0  ;;  %v1144_v42 = vld [vmem:[%s1758_s3 + $0x58] sm:$0xf0] }
  0xf3   :  { %v506_v19 = vmax.f32 %v472_v20, 0.0  ;;  %v429_v44 = vadd.f32 %v428_v28, %v1506_v13  ;;  %v501_v47 = vmax.f32 %v459_v1, 0.0  ;;  %v484_v59 = vmax.f32 %v417_v55, 0.0  ;;  %v1185_v28 = vld [vmem:[%s1758_s3 + $0x24] sm:$0xf] }
  0xf4   :  { %v1120_v20 = vld [vmem:[%s1758_s3 + $0x28] sm:$0xf0]  ;;  %v1139_v1 = vor.u32 %v1189_v34, %v1136_v37 }
  0xf5   :  { %v520_v13 = vpack.c.bf16 %v501_v47, %v500_v30  ;;  %v1194_v30 = vld [vmem:[%s1758_s3 + $0x64] sm:$0xf0] }
  0xf8   :  { %v473_v10 = vpop.f32.mrf.mxu3 }
  0xf9   :  { %v474_v16 = vadd.f32 %v473_v10, %v1493_v8  ;;  %v1123_v10 = vor.u32 %v1185_v28, %v1120_v20 }
  0xfa   :  { %v431_v17 = vpop.f32.mrf.mxu0 }
  0xfb   :  { %v507_v24 = vmax.f32 %v474_v16, 0.0  ;;  %v432_v0 = vadd.f32 %v431_v17, %v1476_v2  ;;  %v489_v2 = vmax.f32 %v429_v44, 0.0  ;;  %v1186_v16 = vld [vmem:[%s1758_s3 + $0x24] sm:$0xf0]  ;;  %v1142_v44 = vld [vmem:[%s1758_s3 + $0x50] sm:$0xf] }
  0xfc   :  { %v1119_v17 = vor.u32 %v1186_v16, %v1118_v11 }
  0xfd   :  { %v523_v32 = vpack.c.bf16 %v507_v24, %v506_v19  ;;  %v490_v48 = vmax.f32 %v432_v0, 0.0  ;;  %v514_v14 = vpack.c.bf16 %v489_v2, %v488_v31  ;;  %v1128_v19 = vld [vmem:[%s1758_s3 + $0x38] sm:$0xf0]  ;;  %v1190_v0 = vld [vmem:[%s1758_s3 + $0x44] sm:$0xf0]  ;;  %v564_v31 = vpop.permute.xlu0 %563 }
  0xfe   :  { %v1131_v24 = vor.u32 %v1187_v18, %v1128_v19  ;;  %v1195_v2 = vld [vmem:[%s1758_s3 + $0x74] sm:$0xf] }
  0xff   :  { %765 = vmatpush.bf16.msra.mxu2 %v523_v32  ;;  %v1127_v32 = vor.u32 %v1188_v27, %v1126_v26 }
 0x102   :  { %v433_v8 = vpop.f32.mrf.mxu0 }
 0x103   :  { %v434_v21 = vadd.f32 %v433_v8, %v1495_v9  ;;  %766 = vmatpush.bf16.msra.mxu2 %v522_v41  ;;  %v419_v9 = vadd.f32 %v418_v45, %v1557_v38  ;;  %v1135_v41 = vor.u32 %v1190_v0, %v1134_v23  ;;  %v1191_v8 = vld [vmem:[%s1758_s3 + $0x54] sm:$0xf] }
 0x104   :  { %v1147_v57 = vor.u32 %v1191_v8, %v1144_v42 }
 0x105   :  { %v491_v49 = vmax.f32 %v434_v21, 0.0  ;;  %v485_v56 = vmax.f32 %v419_v9, 0.0  ;;  %v1192_v21 = vld [vmem:[%s1758_s3 + $0x54] sm:$0xf0]  ;;  %v1158_v9 = vld [vmem:[%s1758_s3 + $0x70] sm:$0xf]  ;;  %v579_v55 = vpop.permute.xlu0 %578 }
 0x106   :  { %v1143_v47 = vor.u32 %v1192_v21, %v1142_v44  ;;  %v1159_v43 = vor.u32 %v1196_v53, %v1158_v9 }
 0x107   :  { %767 = vmatpush.bf16.msra.mxu2 %v521_v50  ;;  %v515_v52 = vpack.c.bf16 %v491_v49, %v490_v48  ;;  %v512_v38 = vpack.c.bf16 %v485_v56, %v484_v59  ;;  %v1152_v48 = vld [vmem:[%s1758_s3 + $0x68] sm:$0xf0]  ;;  %v1150_v50 = vld [vmem:[%s1758_s3 + $0x60] sm:$0xf] }
 0x108   :  { %v1155_v49 = vor.u32 %v1193_v7, %v1152_v48  ;;  %v1151_v51 = vor.u32 %v1194_v30, %v1150_v50 }
 0x109   :  { %716 = vmatpush.bf16.msra.mxu1 %v515_v52  ;;  %v1160_v52 = vld [vmem:[%s1758_s3 + $0x78] sm:$0xf0] }
 0x10a   :  { %v436_v35 = vpop.f32.mrf.mxu0 }
 0x10b   :  { %768 = vmatpush.bf16.msra.mxu2 %v520_v13  ;;  %v437_v61 = vadd.f32 %v436_v35, %v1579_v40  ;;  %v1163_v13 = vor.u32 %v1195_v2, %v1160_v52  ;;  %v569_v35 = vpop.permute.xlu1 %568 }
 0x10d   :  { %717 = vmatpush.bf16.msra.mxu1 %v514_v14  ;;  %v492_v3 = vmax.f32 %v437_v61, 0.0  ;;  %v574_v14 = vpop.permute.xlu2 %573  ;;  %v1713_v59 = vpop.permute.xlu0 %593 }
 0x10f   :  { %769 = vmatpush.bf16.msra.mxu2 %v1577_v39  ;;  %v1104_v39 = vld [vmem:[%s1758_s3 + $0x8] sm:$0xf0] }
 0x110   :  { %v1107_v58 = vor.u32 %v1181_v25, %v1104_v39 }
 0x111   :  { %718 = vmatpush.bf16.msra.mxu1 %v513_v15 }
 0x112   :  { %v438_v60 = vpop.f32.mrf.mxu0 }
 0x113   :  { %v439_v63 = vadd.f32 %v438_v60, %v183_v22  ;;  %770 = vmatpush.bf16.msra.mxu2 %v1571_v62  ;;  %v1102_v62 = vld [vmem:[%s1758_s3] sm:$0xf]  ;;  %v1709_v56 = vpop.permute.xlu1 %583 }
 0x115   :  { %v493_v45 = vmax.f32 %v439_v63, 0.0  ;;  %719 = vmatpush.bf16.msra.mxu1 %v512_v38  ;;  %v1711_v15 = vpop.permute.xlu2 %588 }
 0x117   :  { %771 = vmatpush.bf16.msra.mxu2 %v1575_v33  ;;  %v516_v40 = vpack.c.bf16 %v493_v45, %v492_v3  ;;  %v1182_v33 = vld [vmem:[%s1758_s3 + $0x4] sm:$0xf0]  ;;  %v1719_v45 = vpop.permute.xlu0 %608 }
 0x118   :  { %v1103_v4 = vor.u32 %v1182_v33, %v1102_v62 }
 0x119   :  { %720 = vmatpush.bf16.msra.mxu1 %v1585_v54  ;;  %v1183_v54 = vld [vmem:[%s1758_s3 + $0x14] sm:$0xf] }
 0x11b   :  { %772 = vmatpush.bf16.msra.mxu2 %v516_v40  ;;  %v1715_v22 = vpop.permute.xlu1 %598 }
 0x11d   :  { %721 = vmatpush.bf16.msra.mxu1 %v1573_v12  ;;  %v1112_v12 = vld [vmem:[%s1758_s3 + $0x18] sm:$0xf0]  ;;  %v1717_v63 = vpop.permute.xlu2 %603 }
 0x11e   :  { %773 = vmatmul.bf16.vlgmr.msra.gmra.mxu2 %v1107_v58 }
 0x121   :  { %722 = vmatpush.bf16.msra.mxu1 %v1581_v36  ;;  %v1115_v36 = vor.u32 %v1183_v54, %v1112_v12  ;;  %v849_v54 = vpop.permute.xlu0 %848 }
 0x123   :  { %v1721_v25 = vpop.permute.xlu1 %613 }
 0x125   :  { %723 = vmatpush.bf16.msra.mxu1 %v1587_v46  ;;  %v1111_v46 = vor.u32 %v1184_v6, %v1110_v5  ;;  %v1723_v33 = vpop.permute.xlu2 %618 }
 0x128   :  { %724 = vmatmul.bf16.vlgmr.msra.gmra.mxu1 %v1103_v4 }
 0x12b   :  { %v854_v6 = vpop.permute.xlu1 %853 }
 0x12e   :  { %778 = vmatmul.bf16.gmra.mxu2 %v1115_v36 }
 0x138   :  { %729 = vmatmul.bf16.gmra.mxu1 %v1111_v46 }
 0x13e   :  { %783 = vmatmul.bf16.gmra.mxu2 %v1123_v10 }
 0x148   :  { %734 = vmatmul.bf16.gmra.mxu1 %v1119_v17 }
 0x14e   :  { %788 = vmatmul.bf16.gmra.mxu2 %v1131_v24  ;;  %v859_v24 = vpop.permute.xlu2 %858 }
 0x158   :  { %739 = vmatmul.bf16.gmra.mxu1 %v1127_v32 }
 0x15e   :  { %793 = vmatmul.bf16.gmra.mxu2 %v1139_v1 }
 0x168   :  { %744 = vmatmul.bf16.gmra.mxu1 %v1135_v41  ;;  %v864_v41 = vpop.permute.xlu0 %863 }
 0x16e   :  { %798 = vmatmul.bf16.gmra.mxu2 %v1147_v57 }
 0x178   :  { %749 = vmatmul.bf16.gmra.mxu1 %v1143_v47 }
 0x17e   :  { %803 = vmatmul.bf16.gmra.mxu2 %v1155_v49  ;;  %v869_v49 = vpop.permute.xlu1 %868 }
 0x188   :  { %754 = vmatmul.bf16.gmra.mxu1 %v1151_v51 }
 0x18e   :  { %808 = vmatmul.bf16.gmra.mxu2 %v1163_v13 }
 0x198   :  { %759 = vmatmul.bf16.gmra.mxu1 %v1159_v43 }
 0x1a1   :  { %v774_v60 = vpop.f32.mrf.mxu2 }
 0x1a5   :  { %v725_v61 = vpop.f32.mrf.mxu1 }
 0x1a6   :  { %v726_v38 = vadd.f32 %v725_v61, %v559_v29 }
 0x1a8   :  { %v775_v3 = vadd.f32 %v774_v60, %v726_v38  ;;  %v879_v38 = vpop.permute.xlu0 %878 }
 0x1a9   :  { %v776_v39 = vpop.f32.mrf.mxu2 }
 0x1aa   :  { %v814_v58 = vmax.f32 %v775_v3, 0.0  ;;  %v884_v3 = vpop.permute.xlu1 %883 }
 0x1ac   :  { %v926_v36 = vmul.f32 %v849_v54, %v814_v58 }
 0x1ad   :  { %v727_v40 = vpop.f32.mrf.mxu1 }
 0x1ae   :  { %v728_v62 = vadd.f32 %v727_v40, %v564_v31  ;;  %v943_v20 = vsel %vm942_vm1, %v926_v36, 0.0 }
 0x1b0   :  { %v777_v4 = vadd.f32 %v776_v39, %v728_v62  ;;  %v894_v36 = vpop.permute.xlu0 %893 }
 0x1b1   :  { %v779_v12 = vpop.f32.mrf.mxu2 }
 0x1b2   :  { %v815_v5 = vmax.f32 %v777_v4, 0.0 }
 0x1b4   :  { %v927_v46 = vmul.f32 %v854_v6, %v815_v5 }
 0x1b5   :  { %v730_v28 = vpop.f32.mrf.mxu1 }
 0x1b6   :  { %v944_v10 = vsel %vm942_vm1, %v927_v46, 0.0  ;;  %v731_v11 = vadd.f32 %v730_v28, %v569_v35  ;;  %v624_v28 = vpop.permute.xlu1 %623 }
 0x1b7   :  { %v945_v16 = vadd.f32 %v944_v10, %v943_v20 }
 0x1b8   :  { %v780_v17 = vadd.f32 %v779_v12, %v731_v11 }
 0x1b9   :  { %v781_v18 = vpop.f32.mrf.mxu2 }
 0x1ba   :  { %v816_v19 = vmax.f32 %v780_v17, 0.0 }
 0x1bc   :  { %v928_v26 = vmul.f32 %v859_v24, %v816_v19 }
 0x1bd   :  { %v732_v27 = vpop.f32.mrf.mxu1 }
 0x1be   :  { %v946_v32 = vsel %vm942_vm1, %v928_v26, 0.0  ;;  %v733_v34 = vadd.f32 %v732_v27, %v574_v14 }
 0x1bf   :  { %v947_v37 = vadd.f32 %v946_v32, %v945_v16 }
 0x1c0   :  { %v782_v1 = vadd.f32 %v781_v18, %v733_v34 }
 0x1c1   :  { %v784_v23 = vpop.f32.mrf.mxu2 }
 0x1c2   :  { %v817_v0 = vmax.f32 %v782_v1, 0.0  ;;  %v629_v1 = vpop.permute.xlu0 %628 }
 0x1c4   :  { %v929_v8 = vmul.f32 %v864_v41, %v817_v0 }
 0x1c5   :  { %v735_v42 = vpop.f32.mrf.mxu1 }
 0x1c6   :  { %v948_v57 = vsel %vm942_vm1, %v929_v8, 0.0  ;;  %v736_v44 = vadd.f32 %v735_v42, %v579_v55  ;;  %v874_v55 = vpop.permute.xlu2 %873 }
 0x1c7   :  { %v949_v21 = vadd.f32 %v948_v57, %v947_v37 }
 0x1c8   :  { %v785_v47 = vadd.f32 %v784_v23, %v736_v44 }
 0x1c9   :  { %v786_v7 = vpop.f32.mrf.mxu2 }
 0x1ca   :  { %v818_v48 = vmax.f32 %v785_v47, 0.0 }
 0x1cc   :  { %v930_v50 = vmul.f32 %v869_v49, %v818_v48 }
 0x1cd   :  { %v737_v30 = vpop.f32.mrf.mxu1 }
 0x1ce   :  { %v950_v51 = vsel %vm942_vm1, %v930_v50, 0.0  ;;  %v889_v40 = vpop.permute.xlu2 %888  ;;  %v738_v58 = vadd.f32 %v737_v30, %v1709_v56 }
 0x1cf   :  { %v951_v2 = vadd.f32 %v950_v51, %v949_v21 }
 0x1d0   :  { %v787_v54 = vadd.f32 %v786_v7, %v738_v58 }
 0x1d1   :  { %v789_v52 = vpop.f32.mrf.mxu2 }
 0x1d2   :  { %v819_v20 = vmax.f32 %v787_v54, 0.0 }
 0x1d4   :  { %v931_v19 = vmul.f32 %v874_v55, %v819_v20 }
 0x1d5   :  { %v740_v29 = vpop.f32.mrf.mxu1 }
 0x1d6   :  { %v741_v4 = vadd.f32 %v740_v29, %v1711_v15  ;;  %v899_v16 = vpop.permute.xlu2 %898 }
 0x1d8   :  { %v790_v6 = vadd.f32 %v789_v52, %v741_v4 }
 0x1d9   :  { %v791_v31 = vpop.f32.mrf.mxu2 }
 0x1da   :  { %v820_v17 = vmax.f32 %v790_v6, 0.0 }
 0x1dc   :  { %v932_v32 = vmul.f32 %v879_v38, %v820_v17 }
 0x1dd   :  { %v742_v13 = vpop.f32.mrf.mxu1 }
 0x1de   :  { %v743_v12 = vadd.f32 %v742_v13, %v1713_v59  ;;  %v954_v42 = vsel %vm942_vm1, %v932_v32, 0.0 }
 0x1e0   :  { %v792_v10 = vadd.f32 %v791_v31, %v743_v12 }
 0x1e1   :  { %v794_v35 = vpop.f32.mrf.mxu2 }
 0x1e2   :  { %v821_v24 = vmax.f32 %v792_v10, 0.0 }
 0x1e4   :  { %v933_v23 = vmul.f32 %v884_v3, %v821_v24 }
 0x1e5   :  { %v745_v9 = vpop.f32.mrf.mxu1 }
 0x1e6   :  { %v746_v46 = vadd.f32 %v745_v9, %v1715_v22  ;;  %v956_v7 = vsel %vm942_vm1, %v933_v23, 0.0 }
 0x1e8   :  { %v795_v18 = vadd.f32 %v794_v35, %v746_v46 }
 0x1e9   :  { %v796_v53 = vpop.f32.mrf.mxu2 }
 0x1ea   :  { %v822_v34 = vmax.f32 %v795_v18, 0.0 }
 0x1ec   :  { %v934_v57 = vmul.f32 %v889_v40, %v822_v34 }
 0x1ed   :  { %v747_v14 = vpop.f32.mrf.mxu1 }
 0x1ee   :  { %v748_v11 = vadd.f32 %v747_v14, %v1717_v63  ;;  %v952_v63 = vsel %vm942_vm1, %v931_v19, 0.0  ;;  %v958_v52 = vsel %vm942_vm1, %v934_v57, 0.0 }
 0x1ef   :  { %v953_v47 = vadd.f32 %v952_v63, %v951_v2  ;;  %v909_v2 = vpop.permute.xlu0 %908 }
 0x1f0   :  { %v797_v26 = vadd.f32 %v796_v53, %v748_v11 }
 0x1f1   :  { %v799_v43 = vpop.f32.mrf.mxu2  ;;  %v955_v50 = vadd.f32 %v954_v42, %v953_v47 }
 0x1f2   :  { %v823_v0 = vmax.f32 %v797_v26, 0.0 }
 0x1f3   :  { %v957_v35 = vadd.f32 %v956_v7, %v955_v50 }
 0x1f4   :  { %v935_v48 = vmul.f32 %v894_v36, %v823_v0 }
 0x1f5   :  { %v750_v60 = vpop.f32.mrf.mxu1  ;;  %v959_v55 = vadd.f32 %v958_v52, %v957_v35 }
 0x1f6   :  { %v751_v56 = vadd.f32 %v750_v60, %v1719_v45  ;;  %v904_v45 = vpop.permute.xlu1 %903  ;;  %v960_v9 = vsel %vm942_vm1, %v935_v48, 0.0 }
 0x1f7   :  { %v924_v17 = vpop.permute.xlu0 %923 }
 0x1f8   :  { %v800_v22 = vadd.f32 %v799_v43, %v751_v56 }
 0x1f9   :  { %v801_v61 = vpop.f32.mrf.mxu2 }
 0x1fa   :  { %v824_v44 = vmax.f32 %v800_v22, 0.0  ;;  %v981_v22 = vstv %s1761_s6  ;;  %s1011_s6 = sshll.u32 %s1762_s7, 4  ;;  %s1012_s6 = int_to_ptr.hbm [resolvable:$true] %s1011_s6 }
 0x1fc   :  { %v936_v29 = vmul.f32 %v899_v16, %v824_v44 }
 0x1fd   :  { %v752_v39 = vpop.f32.mrf.mxu1 }
 0x1fe   :  { %v753_v59 = vadd.f32 %v752_v39, %v1721_v25  ;;  %v634_v25 = vpop.permute.xlu2 %633  ;;  %v962_v60 = vsel %vm942_vm1, %v936_v29, 0.0  ;;  %v914_v3 = vpop.permute.xlu1 %913  ;;  %v961_v39 = vadd.f32 %v960_v9, %v959_v55 }
 0x200   :  { %v802_v41 = vadd.f32 %v801_v61, %v753_v59  ;;  %v963_v4 = vadd.f32 %v962_v60, %v961_v39 }
 0x201   :  { %v804_v62 = vpop.f32.mrf.mxu2 }
 0x202   :  { %v825_v49 = vmax.f32 %v802_v41, 0.0 }
 0x204   :  { %v937_v53 = vmul.f32 %v904_v45, %v825_v49 }
 0x205   :  { %v755_v5 = vpop.f32.mrf.mxu1 }
 0x206   :  { %v756_v37 = vadd.f32 %v755_v5, %v1723_v33  ;;  %v964_v40 = vsel %vm942_vm1, %v937_v53, 0.0 }
 0x207   :  { %v965_v6 = vadd.f32 %v964_v40, %v963_v4 }
 0x208   :  { %v805_v21 = vadd.f32 %v804_v62, %v756_v37  ;;  %v919_v62 = vpop.permute.xlu2 %918 }
 0x209   :  { %v806_v15 = vpop.f32.mrf.mxu2 }
 0x20a   :  { %v826_v31 = vmax.f32 %v805_v21, 0.0 }
 0x20c   :  { %v938_v61 = vmul.f32 %v909_v2, %v826_v31 }
 0x20d   :  { %v757_v27 = vpop.f32.mrf.mxu1 }
 0x20e   :  { %v758_v8 = vadd.f32 %v757_v27, %v624_v28  ;;  %v966_v12 = vsel %vm942_vm1, %v938_v61, 0.0 }
 0x20f   :  { %v967_v10 = vadd.f32 %v966_v12, %v965_v6 }
 0x210   :  { %v807_v33 = vadd.f32 %v806_v15, %v758_v8 }
 0x211   :  { %v809_v30 = vpop.f32.mrf.mxu2 }
 0x212   :  { %v827_v14 = vmax.f32 %v807_v33, 0.0 }
 0x214   :  { %v939_v58 = vmul.f32 %v914_v3, %v827_v14 }
 0x215   :  { %v760_v51 = vpop.f32.mrf.mxu1 }
 0x216   :  { %v761_v13 = vadd.f32 %v760_v51, %v629_v1  ;;  %v968_v28 = vsel %vm942_vm1, %v939_v58, 0.0 }
 0x217   :  { %v969_v18 = vadd.f32 %v968_v28, %v967_v10 }
 0x218   :  { %v810_v43 = vadd.f32 %v809_v30, %v761_v13 }
 0x219   :  { %v811_v46 = vpop.f32.mrf.mxu2 }
 0x21a   :  { %v828_v38 = vmax.f32 %v810_v43, 0.0 }
 0x21c   :  { %v940_v36 = vmul.f32 %v919_v62, %v828_v38 }
 0x21d   :  { %v762_v54 = vpop.f32.mrf.mxu1 }
 0x21e   :  { %v763_v5 = vadd.f32 %v762_v54, %v634_v25  ;;  %v970_v11 = vsel %vm942_vm1, %v940_v36, 0.0 }
 0x21f   :  { %v971_v19 = vadd.f32 %v970_v11, %v969_v18 }
 0x220   :  { %v812_v20 = vadd.f32 %v811_v46, %v763_v5 }
 0x222   :  { %v829_v16 = vmax.f32 %v812_v20, 0.0 }
 0x224   :  { %v941_v56 = vmul.f32 %v924_v17, %v829_v16 }
 0x226   :  { %v972_v15 = vsel %vm942_vm1, %v941_v56, 0.0 }
 0x227   :  { %v973_v24 = vadd.f32 %v972_v15, %v971_v19 }
 0x229   :  { %v974_v26 = vrot.slane %v973_v24, 4 }
 0x22b   :  { %v975_v59 = vadd.f32 %v974_v26, %v973_v24 }
 0x22d   :  { %v976_v27 = vrot.slane %v975_v59, 2 }
 0x22f   :  { %v977_v32 = vadd.f32 %v976_v27, %v975_v59 }
 0x231   :  { %v978_v34 = vrot.slane %v977_v32, 1 }
 0x233   :  { %v979_v37 = vadd.f32 %v978_v34, %v977_v32 }
 0x235   :  { %v982_v1 = vadd.f32 %v981_v22, %v979_v37 }
 0x237   :  { %v1164_v63 = vmul.f32 -1.442695, %v982_v1 }
 0x239   :  { %1203 = vpow2.f32 %v1164_v63 }
 0x23f   :  { %v1204_v23 = vpop.eup %1203 }
 0x240   :  { %v986_v0 = vadd.f32 1.0, %v1204_v23 }
 0x242   :  { %1205 = vrcp.f32 %v986_v0  ;;  %v998_v42 = vand.u32 2147483648, %v986_v0  ;;  %v996_v44 = vand.u32 2147483647, %v986_v0  ;;  %vm992_vm3 = vweird.f32 %v986_v0 }
 0x244   :  { %v999_v25 = vor.u32 1.1754944e-38, %v998_v42  ;;  %vm997_vm6 = vcmp.eq.f32.partialorder %v996_v44, 8.507059e+37 }
 0x248   :  { %v1206_v41 = vpop.eup %1205 }
 0x249   :  { %v988_v8 = vmul.f32 %v1206_v41, %v986_v0  ;;  %vm993_vm2 = vweird.f32 %v1206_v41 }
 0x24a   :  { %vm994_vm4 = vmor %vm992_vm3, %vm993_vm2 }
 0x24b   :  { %v989_v45 = vsub.f32 1.0, %v988_v8 }
 0x24d   :  { %v990_v57 = vmul.f32 %v1206_v41, %v989_v45 }
 0x24f   :  { %v991_v21 = vadd.f32 %v1206_v41, %v990_v57 }
 0x251   :  { %v995_v47 = vsel %vm994_vm4, %v1206_v41, %v991_v21 }
 0x252   :  { %v1000_v7 = vsel %vm997_vm6, %v999_v25, %v995_v47 }
 0x253   :  { %1003 = vst.msk [vmem:[#allocation3] sm:$0x1] %vm1002_vm5, %v1000_v7 }
 0x254   :  { %1014 = dma.vmem_to_hbm [thread:$0]  %s1010_s22, 16, %s1012_s6, [#allocation4]  }
 0x255   :  { %1231 = dma.done.wait [#allocation4], 16  }
 0x256   :  { %1232 = vsyncadd [#allocation4], 4294967280 }
 0x257   :  { %1019 = vsyncpa [#allocation4], 1 }

</bundles_post_ra>
